<compile_context>
chip_gen: v6e
topology: v6e:2x2x1
jax: 0.10.0
libtpu: 0.0.40
codegen_flags: <defaults>
</compile_context>

<pallas_src>
import jax
import jax.numpy as jnp
from jax.experimental import pallas as pl
from jax.experimental.pallas import tpu as pltpu

EPS = 1e-5

# ---- packed-slab layout constants -----------------------------------------
LANES = 256
# branch slab (bf16): row offsets are multiples of 16 (bf16 sublane packing)
BR_W1_R, BR_W2_R, BR_W3_R, BR_ROWS = 0, 208, 416, 512     # w1[196,200] w2[200,84] w3[84,10]
# head slab (f32): row offsets are multiples of 8
HD_W1_R, HD_W2_R, HD_W3_R, HD_ROWS = 0, 24, 224, 320      # w1[20,200] w2[200,84] w3[84,1]
# bias slab rows: 0-2 branch1, 3-5 branch2, 6-8 head
BIAS_ROWS = 16


# ---------------------------------------------------------------------------
# Fused kernel: both Pre_A_Loss branches + classifier head in one pallas_call
# ---------------------------------------------------------------------------
def _fused_kernel(x_ref, wb_ref, wh_ref, bias_ref, out_ref):
    # x_ref  : [2, B, 196] bf16   (channel-major; leading-dim index = free view)
    # wb_ref : [2, 512, 256] bf16 (per-branch weight slab, BN folded)
    # wh_ref : [320, 256] f32     (head weight slab, BN folded)
    # bias_ref: [16, 256] f32     (one bias per sublane row)
    # out_ref: [B, 128] f32       (lane-dense packed output)
    B = x_ref.shape[1]

    def branch(ci, brow):
        xi = x_ref[ci]                                           # [B, 196] bf16
        b1 = bias_ref[brow + 0:brow + 1, 0:200]                  # [1, 200] f32
        b2 = bias_ref[brow + 1:brow + 2, 0:84]
        b3 = bias_ref[brow + 2:brow + 3, 0:10]
        # Linear(196,200) + ReLU
        h = jnp.dot(xi, wb_ref[ci, BR_W1_R:BR_W1_R + 196, 0:200],
                    preferred_element_type=jnp.float32) + b1
        h = jnp.maximum(h, 0.0)
        # [BN folded] Linear(200,84) + ReLU
        h = jnp.dot(h.astype(jnp.bfloat16), wb_ref[ci, BR_W2_R:BR_W2_R + 200, 0:84],
                    preferred_element_type=jnp.float32) + b2
        h = jnp.maximum(h, 0.0)
        # [BN folded] Linear(84,10) + Softmax(dim=1)   (exact divide, f32)
        logits = jnp.dot(h.astype(jnp.bfloat16), wb_ref[ci, BR_W3_R:BR_W3_R + 84, 0:10],
                         preferred_element_type=jnp.float32) + b3
        m = jnp.max(logits, axis=1, keepdims=True)
        e = jnp.exp(logits - m)
        return e / jnp.sum(e, axis=1, keepdims=True)             # [B, 10] f32

    p1 = branch(0, 0)
    p2 = branch(1, 3)

    # ---- head on concat([p1, p2], dim=1); all f32 (accuracy is essentially free) --
    cat = jnp.concatenate([p1, p2], axis=1)                      # [B, 20] f32 (XLU shift)
    h = jnp.dot(cat, wh_ref[HD_W1_R:HD_W1_R + 20, 0:200],
                preferred_element_type=jnp.float32) + bias_ref[6:7, 0:200]
    h = jnp.maximum(h, 0.0)
    # TODO(synk): Dropout(p=0.5) is identity in eval mode (no train-mode RNG in kernel).
    h = jnp.dot(h, wh_ref[HD_W2_R:HD_W2_R + 200, 0:84],
                preferred_element_type=jnp.float32) + bias_ref[7:8, 0:84]
    h = jnp.maximum(h, 0.0)
    z = jnp.dot(h, wh_ref[HD_W3_R:HD_W3_R + 84, 0:1],
                preferred_element_type=jnp.float32) + bias_ref[8:9, 0:1]
    res = jax.nn.sigmoid(z)                                      # [B, 1] f32

    # single lane-dense, unmasked store: [x1 | x2 | res | zero padding]
    pad = jnp.zeros((B, 128 - 21), jnp.float32)
    out_ref[...] = jnp.concatenate([p1, p2, res, pad], axis=1)   # [B, 128]


# ---------------------------------------------------------------------------
# Parameter construction (deterministic, synthetic) + BN folding + packing
# ---------------------------------------------------------------------------
def _linear_params(key, fan_in, fan_out, scale=0.05):
    kw, kb = jax.random.split(key)
    w = jax.random.normal(kw, (fan_in, fan_out), jnp.float32) * scale   # [in, out]
    b = jax.random.normal(kb, (1, fan_out), jnp.float32) * scale
    return w, b


def _bn_params(key, n):
    k1, k2, k3 = jax.random.split(key, 3)
    gamma = 1.0 + 0.1 * jax.random.normal(k1, (n,), jnp.float32)
    beta = 0.1 * jax.random.normal(k2, (n,), jnp.float32)
    mean = 0.1 * jax.random.normal(k3, (n,), jnp.float32)
    var = jnp.ones((n,), jnp.float32)
    return gamma, beta, mean, var


def _fold_bn_into_next_linear(bn, w_next, b_next, eps=EPS):
    """(h*s + t) @ W + b  ==  h @ (s[:,None]*W) + (t @ W + b)   (exact)."""
    gamma, beta, mean, var = bn
    scale = gamma / jnp.sqrt(var + eps)
    shift = beta - mean * scale
    w_f = scale[:, None] * w_next
    b_f = b_next + shift[None, :] @ w_next
    return w_f, b_f


def make_branch_raw(key):
    k1, k2, k3, k4, k5 = jax.random.split(key, 5)
    w1, b1 = _linear_params(k1, 196, 200)
    bn1 = _bn_params(k2, 200)
    w2, b2 = _linear_params(k3, 200, 84)
    bn2 = _bn_params(k4, 84)
    w3, b3 = _linear_params(k5, 84, 10)
    return (w1, b1, bn1, w2, b2, bn2, w3, b3)


def make_head_raw(key):
    k1, k2, k3, k4, k5 = jax.random.split(key, 5)
    w1, b1 = _linear_params(k1, 20, 200)
    bn1 = _bn_params(k2, 200)
    w2, b2 = _linear_params(k3, 200, 84)
    bn2 = _bn_params(k4, 84)
    w3, b3 = _linear_params(k5, 84, 1)
    return (w1, b1, bn1, w2, b2, bn2, w3, b3)


def pack_params(raw1, raw2, rawh):
    """Fold BN into the following Linears, pack into lane-aligned slabs."""

    def fold3(raw):
        w1, b1, bn1, w2, b2, bn2, w3, b3 = raw
        w2f, b2f = _fold_bn_into_next_linear(bn1, w2, b2)
        w3f, b3f = _fold_bn_into_next_linear(bn2, w3, b3)
        return (w1, w2f, w3f), (b1.reshape(-1), b2f.reshape(-1), b3f.reshape(-1))

    def branch_slab(ws):
        w1, w2, w3 = ws
        s = jnp.zeros((BR_ROWS, LANES), jnp.float32)
        s = s.at[BR_W1_R:BR_W1_R + 196, 0:200].set(w1)
        s = s.at[BR_W2_R:BR_W2_R + 200, 0:84].set(w2)
        s = s.at[BR_W3_R:BR_W3_R + 84, 0:10].set(w3)
        return s.astype(jnp.bfloat16)

    def head_slab(ws):
        w1, w2, w3 = ws
        s = jnp.zeros((HD_ROWS, LANES), jnp.float32)
        s = s.at[HD_W1_R:HD_W1_R + 20, 0:200].set(w1)
        s = s.at[HD_W2_R:HD_W2_R + 200, 0:84].set(w2)
        s = s.at[HD_W3_R:HD_W3_R + 84, 0:1].set(w3)
        return s                                                  # keep f32

    ws1, bs1 = fold3(raw1)
    ws2, bs2 = fold3(raw2)
    wsh, bsh = fold3(rawh)

    wslabs = jnp.stack([branch_slab(ws1), branch_slab(ws2)], axis=0)   # [2,512,256] bf16
    hslab = head_slab(wsh)                                             # [320,256] f32

    bias = jnp.zeros((BIAS_ROWS, LANES), jnp.float32)
    for i, b in enumerate(list(bs1) + list(bs2) + list(bsh)):
        bias = bias.at[i, 0:b.shape[0]].set(b)                         # [16,256] f32
    return wslabs, hslab, bias


# ---------------------------------------------------------------------------
# Single fused pallas_call wrapper
# ---------------------------------------------------------------------------
@jax.jit
def aloss_mlpnet_forward(x, wslabs, hslab, bias):
    """x: [B, 2, 14, 14] float32.  Returns (x1, x2, res) like the PyTorch module."""
    B = x.shape[0]
    # channel-major, bf16 in the wrapper: kernel indexes the leading dim (free view)
    xc = jnp.transpose(x.reshape(B, 2, 196), (1, 0, 2)).astype(jnp.bfloat16)
    args = (xc, wslabs, hslab, bias)

    # Advisory cost so XLA doesn't pessimize scheduling around this tiny call.
    macs_per_row = 2 * (196 * 200 + 200 * 84 + 84 * 10) + (20 * 200 + 200 * 84 + 84)
    cost = pl.CostEstimate(
        flops=2 * B * macs_per_row,
        transcendentals=B * (2 * 10 + 1),                 # exps + sigmoid
        bytes_accessed=sum(int(a.size) * a.dtype.itemsize for a in args) + B * 128 * 4,
    )

    vmem = lambda: pl.BlockSpec(memory_space=pltpu.MemorySpace.VMEM)
    out = pl.pallas_call(
        _fused_kernel,
        out_shape=jax.ShapeDtypeStruct((B, 128), jnp.float32),
        in_specs=[vmem() for _ in args],
        out_specs=vmem(),
        cost_estimate=cost,
    )(*args)
    # TODO(synk): for large batch, add a 1-D batch grid (row tile mult. of 8;
    # 128 rows on v5e / 256 on v6e+v7x; weights index_map lambda i: (0, 0);
    # dimension_semantics=("parallel",); vmem_limit sized for v7x's 64 MiB).
    return out[:, 0:10], out[:, 10:20], out[:, 20:21]


# ---------------------------------------------------------------------------
# Pure-JAX reference (f32, unfolded BN) for correctness checking
# ---------------------------------------------------------------------------
def _bn_apply(h, bn):
    gamma, beta, mean, var = bn
    return (h - mean) / jnp.sqrt(var + EPS) * gamma + beta


def _ref_branch(xi, raw):
    w1, b1, bn1, w2, b2, bn2, w3, b3 = raw
    h = _bn_apply(jnp.maximum(xi @ w1 + b1, 0.0), bn1)
    h = _bn_apply(jnp.maximum(h @ w2 + b2, 0.0), bn2)
    return jax.nn.softmax(h @ w3 + b3, axis=1)


def _ref_forward(x, raw1, raw2, rawh):
    B = x.shape[0]
    x1 = _ref_branch(x[:, 0].reshape(B, 196), raw1)
    x2 = _ref_branch(x[:, 1].reshape(B, 196), raw2)
    cat = jnp.concatenate([x1, x2], axis=1)
    w1, b1, bn1, w2, b2, bn2, w3, b3 = rawh
    h = _bn_apply(jnp.maximum(cat @ w1 + b1, 0.0), bn1)
    h = _bn_apply(jnp.maximum(h @ w2 + b2, 0.0), bn2)
    return x1, x2, jax.nn.sigmoid(h @ w3 + b3)


# ---------------------------------------------------------------------------
if __name__ == "__main__":
    key = jax.random.PRNGKey(0)
    k_x, k_p1, k_p2, k_ph = jax.random.split(key, 4)

    B = 8
    x = jax.random.normal(k_x, (B, 2, 14, 14), jnp.float32)

    raw1, raw2, rawh = make_branch_raw(k_p1), make_branch_raw(k_p2), make_head_raw(k_ph)
    wslabs, hslab, bias = pack_params(raw1, raw2, rawh)

    x1, x2, res = aloss_mlpnet_forward(x, wslabs, hslab, bias)
    jax.block_until_ready((x1, x2, res))

    # correctness vs. f32 reference (bf16 MXU path in branches -> modest tolerance)
    x1_r, x2_r, res_r = _ref_forward(x, raw1, raw2, rawh)

    assert x1.shape == (B, 10) and x2.shape == (B, 10) and res.shape == (B, 1)
    assert bool(jnp.allclose(jnp.sum(x1, axis=1), 1.0, atol=1e-3))   # exact divide
    assert bool(jnp.allclose(jnp.sum(x2, axis=1), 1.0, atol=1e-3))
    assert bool(jnp.all((res > 0.0) & (res < 1.0)))
    assert bool(jnp.allclose(x1, x1_r, atol=2e-2))
    assert bool(jnp.allclose(x2, x2_r, atol=2e-2))
    assert bool(jnp.allclose(res, res_r, atol=2e-2))

    print("KERNEL_OK")
</pallas_src>

<mosaic_0001>
module attributes {stable_mosaic.version = 11 : i64} {
  func.func @_fused_kernel(%arg0: memref<2x8x196xbf16, #tpu.memory_space<vmem>>, %arg1: memref<2x512x256xbf16, #tpu.memory_space<vmem>>, %arg2: memref<320x256xf32, #tpu.memory_space<vmem>>, %arg3: memref<16x256xf32, #tpu.memory_space<vmem>>, %arg4: memref<8x128xf32, #tpu.memory_space<vmem>>) attributes {dimension_semantics = [], scalar_prefetch = 0 : i64, scratch_operands = 0 : i64, tpu.core_type = #tpu.core_type<tc>} {
    %c0 = arith.constant 0 : index
    %c0_0 = arith.constant 0 : index
    %c0_1 = arith.constant 0 : index
    %0 = vector.load %arg0[%c0, %c0_0, %c0_1] : memref<2x8x196xbf16, #tpu.memory_space<vmem>>, vector<1x8x196xbf16>
    %1 = vector.shape_cast %0 : vector<1x8x196xbf16> to vector<8x196xbf16>
    %c0_2 = arith.constant 0 : index
    %c0_3 = arith.constant 0 : index
    %2 = vector.load %arg3[%c0_2, %c0_3] : memref<16x256xf32, #tpu.memory_space<vmem>>, vector<1x200xf32>
    %c1 = arith.constant 1 : index
    %c0_4 = arith.constant 0 : index
    %3 = vector.load %arg3[%c1, %c0_4] : memref<16x256xf32, #tpu.memory_space<vmem>>, vector<1x84xf32>
    %c2 = arith.constant 2 : index
    %c0_5 = arith.constant 0 : index
    %4 = vector.load %arg3[%c2, %c0_5] : memref<16x256xf32, #tpu.memory_space<vmem>>, vector<1x10xf32>
    %c0_6 = arith.constant 0 : index
    %c0_7 = arith.constant 0 : index
    %c0_8 = arith.constant 0 : index
    %5 = vector.load %arg1[%c0_6, %c0_7, %c0_8] : memref<2x512x256xbf16, #tpu.memory_space<vmem>>, vector<1x196x200xbf16>
    %6 = vector.shape_cast %5 : vector<1x196x200xbf16> to vector<196x200xbf16>
    %cst = arith.constant dense<0.000000e+00> : vector<8x200xf32>
    %7 = tpu.matmul %1, %6, %cst {dimension_numbers = #tpu.dot_dimension_numbers<[1], [0], [0], [1], [0, 0, 1, 1], [], []>} : vector<8x196xbf16>, vector<196x200xbf16>, vector<8x200xf32> -> vector<8x200xf32>
    %8 = vector.broadcast %2 : vector<1x200xf32> to vector<8x200xf32>
    %9 = arith.addf %7, %8 : vector<8x200xf32>
    %cst_9 = arith.constant 0.000000e+00 : f32
    %10 = vector.broadcast %cst_9 : f32 to vector<8x200xf32>
    %11 = arith.maximumf %9, %10 : vector<8x200xf32>
    %12 = arith.truncf %11 : vector<8x200xf32> to vector<8x200xbf16>
    %c0_10 = arith.constant 0 : index
    %c208 = arith.constant 208 : index
    %c0_11 = arith.constant 0 : index
    %13 = vector.load %arg1[%c0_10, %c208, %c0_11] : memref<2x512x256xbf16, #tpu.memory_space<vmem>>, vector<1x200x84xbf16>
    %14 = vector.shape_cast %13 : vector<1x200x84xbf16> to vector<200x84xbf16>
    %cst_12 = arith.constant dense<0.000000e+00> : vector<8x84xf32>
    %15 = tpu.matmul %12, %14, %cst_12 {dimension_numbers = #tpu.dot_dimension_numbers<[1], [0], [0], [1], [0, 0, 1, 1], [], []>} : vector<8x200xbf16>, vector<200x84xbf16>, vector<8x84xf32> -> vector<8x84xf32>
    %16 = vector.broadcast %3 : vector<1x84xf32> to vector<8x84xf32>
    %17 = arith.addf %15, %16 : vector<8x84xf32>
    %cst_13 = arith.constant 0.000000e+00 : f32
    %18 = vector.broadcast %cst_13 : f32 to vector<8x84xf32>
    %19 = arith.maximumf %17, %18 : vector<8x84xf32>
    %20 = arith.truncf %19 : vector<8x84xf32> to vector<8x84xbf16>
    %c0_14 = arith.constant 0 : index
    %c416 = arith.constant 416 : index
    %c0_15 = arith.constant 0 : index
    %21 = vector.load %arg1[%c0_14, %c416, %c0_15] : memref<2x512x256xbf16, #tpu.memory_space<vmem>>, vector<1x84x10xbf16>
    %22 = vector.shape_cast %21 : vector<1x84x10xbf16> to vector<84x10xbf16>
    %cst_16 = arith.constant dense<0.000000e+00> : vector<8x10xf32>
    %23 = tpu.matmul %20, %22, %cst_16 {dimension_numbers = #tpu.dot_dimension_numbers<[1], [0], [0], [1], [0, 0, 1, 1], [], []>} : vector<8x84xbf16>, vector<84x10xbf16>, vector<8x10xf32> -> vector<8x10xf32>
    %24 = vector.broadcast %4 : vector<1x10xf32> to vector<8x10xf32>
    %25 = arith.addf %23, %24 : vector<8x10xf32>
    %cst_17 = arith.constant dense<0xFF800000> : vector<8xf32>
    %26 = vector.multi_reduction <maximumf>, %25, %cst_17 [1] : vector<8x10xf32> to vector<8xf32>
    %27 = vector.shape_cast %26 : vector<8xf32> to vector<8x1xf32>
    %28 = vector.broadcast %27 : vector<8x1xf32> to vector<8x10xf32>
    %29 = arith.subf %25, %28 : vector<8x10xf32>
    %30 = math.exp %29 : vector<8x10xf32>
    %cst_18 = arith.constant dense<0.000000e+00> : vector<8xf32>
    %31 = vector.multi_reduction <add>, %30, %cst_18 [1] : vector<8x10xf32> to vector<8xf32>
    %32 = vector.shape_cast %31 : vector<8xf32> to vector<8x1xf32>
    %33 = vector.broadcast %32 : vector<8x1xf32> to vector<8x10xf32>
    %34 = arith.divf %30, %33 : vector<8x10xf32>
    %c1_19 = arith.constant 1 : index
    %c0_20 = arith.constant 0 : index
    %c0_21 = arith.constant 0 : index
    %35 = vector.load %arg0[%c1_19, %c0_20, %c0_21] : memref<2x8x196xbf16, #tpu.memory_space<vmem>>, vector<1x8x196xbf16>
    %36 = vector.shape_cast %35 : vector<1x8x196xbf16> to vector<8x196xbf16>
    %c3 = arith.constant 3 : index
    %c0_22 = arith.constant 0 : index
    %37 = vector.load %arg3[%c3, %c0_22] : memref<16x256xf32, #tpu.memory_space<vmem>>, vector<1x200xf32>
    %c4 = arith.constant 4 : index
    %c0_23 = arith.constant 0 : index
    %38 = vector.load %arg3[%c4, %c0_23] : memref<16x256xf32, #tpu.memory_space<vmem>>, vector<1x84xf32>
    %c5 = arith.constant 5 : index
    %c0_24 = arith.constant 0 : index
    %39 = vector.load %arg3[%c5, %c0_24] : memref<16x256xf32, #tpu.memory_space<vmem>>, vector<1x10xf32>
    %c1_25 = arith.constant 1 : index
    %c0_26 = arith.constant 0 : index
    %c0_27 = arith.constant 0 : index
    %40 = vector.load %arg1[%c1_25, %c0_26, %c0_27] : memref<2x512x256xbf16, #tpu.memory_space<vmem>>, vector<1x196x200xbf16>
    %41 = vector.shape_cast %40 : vector<1x196x200xbf16> to vector<196x200xbf16>
    %cst_28 = arith.constant dense<0.000000e+00> : vector<8x200xf32>
    %42 = tpu.matmul %36, %41, %cst_28 {dimension_numbers = #tpu.dot_dimension_numbers<[1], [0], [0], [1], [0, 0, 1, 1], [], []>} : vector<8x196xbf16>, vector<196x200xbf16>, vector<8x200xf32> -> vector<8x200xf32>
    %43 = vector.broadcast %37 : vector<1x200xf32> to vector<8x200xf32>
    %44 = arith.addf %42, %43 : vector<8x200xf32>
    %cst_29 = arith.constant 0.000000e+00 : f32
    %45 = vector.broadcast %cst_29 : f32 to vector<8x200xf32>
    %46 = arith.maximumf %44, %45 : vector<8x200xf32>
    %47 = arith.truncf %46 : vector<8x200xf32> to vector<8x200xbf16>
    %c1_30 = arith.constant 1 : index
    %c208_31 = arith.constant 208 : index
    %c0_32 = arith.constant 0 : index
    %48 = vector.load %arg1[%c1_30, %c208_31, %c0_32] : memref<2x512x256xbf16, #tpu.memory_space<vmem>>, vector<1x200x84xbf16>
    %49 = vector.shape_cast %48 : vector<1x200x84xbf16> to vector<200x84xbf16>
    %cst_33 = arith.constant dense<0.000000e+00> : vector<8x84xf32>
    %50 = tpu.matmul %47, %49, %cst_33 {dimension_numbers = #tpu.dot_dimension_numbers<[1], [0], [0], [1], [0, 0, 1, 1], [], []>} : vector<8x200xbf16>, vector<200x84xbf16>, vector<8x84xf32> -> vector<8x84xf32>
    %51 = vector.broadcast %38 : vector<1x84xf32> to vector<8x84xf32>
    %52 = arith.addf %50, %51 : vector<8x84xf32>
    %cst_34 = arith.constant 0.000000e+00 : f32
    %53 = vector.broadcast %cst_34 : f32 to vector<8x84xf32>
    %54 = arith.maximumf %52, %53 : vector<8x84xf32>
    %55 = arith.truncf %54 : vector<8x84xf32> to vector<8x84xbf16>
    %c1_35 = arith.constant 1 : index
    %c416_36 = arith.constant 416 : index
    %c0_37 = arith.constant 0 : index
    %56 = vector.load %arg1[%c1_35, %c416_36, %c0_37] : memref<2x512x256xbf16, #tpu.memory_space<vmem>>, vector<1x84x10xbf16>
    %57 = vector.shape_cast %56 : vector<1x84x10xbf16> to vector<84x10xbf16>
    %cst_38 = arith.constant dense<0.000000e+00> : vector<8x10xf32>
    %58 = tpu.matmul %55, %57, %cst_38 {dimension_numbers = #tpu.dot_dimension_numbers<[1], [0], [0], [1], [0, 0, 1, 1], [], []>} : vector<8x84xbf16>, vector<84x10xbf16>, vector<8x10xf32> -> vector<8x10xf32>
    %59 = vector.broadcast %39 : vector<1x10xf32> to vector<8x10xf32>
    %60 = arith.addf %58, %59 : vector<8x10xf32>
    %cst_39 = arith.constant dense<0xFF800000> : vector<8xf32>
    %61 = vector.multi_reduction <maximumf>, %60, %cst_39 [1] : vector<8x10xf32> to vector<8xf32>
    %62 = vector.shape_cast %61 : vector<8xf32> to vector<8x1xf32>
    %63 = vector.broadcast %62 : vector<8x1xf32> to vector<8x10xf32>
    %64 = arith.subf %60, %63 : vector<8x10xf32>
    %65 = math.exp %64 : vector<8x10xf32>
    %cst_40 = arith.constant dense<0.000000e+00> : vector<8xf32>
    %66 = vector.multi_reduction <add>, %65, %cst_40 [1] : vector<8x10xf32> to vector<8xf32>
    %67 = vector.shape_cast %66 : vector<8xf32> to vector<8x1xf32>
    %68 = vector.broadcast %67 : vector<8x1xf32> to vector<8x10xf32>
    %69 = arith.divf %65, %68 : vector<8x10xf32>
    %70 = tpu.concatenate %34, %69 in 1 : vector<8x10xf32>, vector<8x10xf32> -> vector<8x20xf32>
    %c0_41 = arith.constant 0 : index
    %c0_42 = arith.constant 0 : index
    %71 = vector.load %arg2[%c0_41, %c0_42] : memref<320x256xf32, #tpu.memory_space<vmem>>, vector<20x200xf32>
    %cst_43 = arith.constant dense<0.000000e+00> : vector<8x200xf32>
    %72 = tpu.matmul %70, %71, %cst_43 {dimension_numbers = #tpu.dot_dimension_numbers<[1], [0], [0], [1], [0, 0, 1, 1], [], []>} : vector<8x20xf32>, vector<20x200xf32>, vector<8x200xf32> -> vector<8x200xf32>
    %c6 = arith.constant 6 : index
    %c0_44 = arith.constant 0 : index
    %73 = vector.load %arg3[%c6, %c0_44] : memref<16x256xf32, #tpu.memory_space<vmem>>, vector<1x200xf32>
    %74 = vector.broadcast %73 : vector<1x200xf32> to vector<8x200xf32>
    %75 = arith.addf %72, %74 : vector<8x200xf32>
    %cst_45 = arith.constant 0.000000e+00 : f32
    %76 = vector.broadcast %cst_45 : f32 to vector<8x200xf32>
    %77 = arith.maximumf %75, %76 : vector<8x200xf32>
    %c24 = arith.constant 24 : index
    %c0_46 = arith.constant 0 : index
    %78 = vector.load %arg2[%c24, %c0_46] : memref<320x256xf32, #tpu.memory_space<vmem>>, vector<200x84xf32>
    %cst_47 = arith.constant dense<0.000000e+00> : vector<8x84xf32>
    %79 = tpu.matmul %77, %78, %cst_47 {dimension_numbers = #tpu.dot_dimension_numbers<[1], [0], [0], [1], [0, 0, 1, 1], [], []>} : vector<8x200xf32>, vector<200x84xf32>, vector<8x84xf32> -> vector<8x84xf32>
    %c7 = arith.constant 7 : index
    %c0_48 = arith.constant 0 : index
    %80 = vector.load %arg3[%c7, %c0_48] : memref<16x256xf32, #tpu.memory_space<vmem>>, vector<1x84xf32>
    %81 = vector.broadcast %80 : vector<1x84xf32> to vector<8x84xf32>
    %82 = arith.addf %79, %81 : vector<8x84xf32>
    %cst_49 = arith.constant 0.000000e+00 : f32
    %83 = vector.broadcast %cst_49 : f32 to vector<8x84xf32>
    %84 = arith.maximumf %82, %83 : vector<8x84xf32>
    %c224 = arith.constant 224 : index
    %c0_50 = arith.constant 0 : index
    %85 = vector.load %arg2[%c224, %c0_50] : memref<320x256xf32, #tpu.memory_space<vmem>>, vector<84x1xf32>
    %cst_51 = arith.constant dense<0.000000e+00> : vector<8x1xf32>
    %86 = tpu.matmul %84, %85, %cst_51 {dimension_numbers = #tpu.dot_dimension_numbers<[1], [0], [0], [1], [0, 0, 1, 1], [], []>} : vector<8x84xf32>, vector<84x1xf32>, vector<8x1xf32> -> vector<8x1xf32>
    %c8 = arith.constant 8 : index
    %c0_52 = arith.constant 0 : index
    %87 = vector.load %arg3[%c8, %c0_52] : memref<16x256xf32, #tpu.memory_space<vmem>>, vector<1x1xf32>
    %88 = vector.broadcast %87 : vector<1x1xf32> to vector<8x1xf32>
    %89 = arith.addf %86, %88 : vector<8x1xf32>
    %90 = arith.negf %89 : vector<8x1xf32>
    %91 = math.exp %90 : vector<8x1xf32>
    %cst_53 = arith.constant 1.000000e+00 : f32
    %92 = vector.broadcast %cst_53 : f32 to vector<8x1xf32>
    %93 = arith.addf %92, %91 : vector<8x1xf32>
    %94 = arith.divf %92, %93 : vector<8x1xf32>
    %cst_54 = arith.constant 0.000000e+00 : f32
    %95 = vector.broadcast %cst_54 : f32 to vector<8x107xf32>
    %96 = tpu.concatenate %34, %69, %94, %95 in 1 : vector<8x10xf32>, vector<8x10xf32>, vector<8x1xf32>, vector<8x107xf32> -> vector<8x128xf32>
    %c0_55 = arith.constant 0 : index
    %c0_56 = arith.constant 0 : index
    %97 = vector.load %arg4[%c0_55, %c0_56] : memref<8x128xf32, #tpu.memory_space<vmem>>, vector<8x128xf32>
    tpu.vector_store %arg4[%c0_55, %c0_56], %96 {strides = array<i32>} : memref<8x128xf32, #tpu.memory_space<vmem>>, vector<8x128xf32>,
    return
  }
}

</mosaic_0001>

<bundles_post_ra>
// kernel: aloss_mlpnet_forward.1
= control target key start
LH: loop header
LB: loop body
LE: loop exit
PB: predicated region body
PF: predicated region fallthrough
CT: control target
= control target key end

     0   :  { %9 = vsyncpa [#allocation3], 0  ;;  %s1658_s15 = smov [#allocation2]   ;;  %s1993_s0 = inlined_call_operand.vmem [shape: bf16[2,8,196], index: 0, kind: input, shape index: {}]   ;;  %s1994_s1 = inlined_call_operand.hbm [shape: bf16[2,512,256], index: 1, kind: input, shape index: {}]   ;;  %s1995_s2 = inlined_call_operand.vmem [shape: f32[320,256], index: 2, kind: input, shape index: {}]   ;;  %s1996_s3 = inlined_call_operand.vmem [shape: f32[16,256], index: 3, kind: input, shape index: {}]   ;;  %s1997_s4 = inlined_call_operand.vmem [shape: f32[8,128], index: 4, kind: output, shape index: {}]  }
   0x1   :  { %s17_s16 = sshll.u32 %s1658_s15, 4  ;;  %s18_s16 = int_to_ptr.vmem [resolvable:$true] %s17_s16 }
   0x2   :  { %s1644_s17 = scalar_lea.vmem %s18_s16, 16384  ;;  %p1649_p1 = scmp.lt.s32.totalorder %s18_s16, %s18_s16 }
   0x3   :  { %p1645_p0 = scmp.ne.s32.totalorder %s18_s16, %s1644_s17  ;;  %p1650_p2 = scmp.lt.s32.totalorder %s1644_s17, %s1644_s17 }
   0x5   :  { %p1651_p3 = por %p1650_p2, %p1649_p1 }
   0x7   :  { %p1652_p4 = pnand %p1651_p3, %p1645_p0 }
   0x9   :  { %1655 = shalt.err (!%p1652_p4)
}
   0xa   :  { %s1659_s18 = smov 128   ;;  %s1660_s19 = smov 8  }
   0xb   :  { %23 = dma.hbm_to_vmem [thread:$0]  %s1994_s1, 16384, %s18_s16, [#allocation3], %s1659_s18, %s1659_s18, %s1660_s19  }
   0xc   :  { %1656 = dma.done.wait [#allocation3], 16384  }
   0xd   :  { %1657 = vsyncadd [#allocation3], 4294950912  ;;  %v1661_v0 = vmov 0   ;;  %v1506_v1 = vld [vmem:[#allocation2 + $0x74] ss:$8 sps:$4 sm:$0xff]   ;;  %v1698_v12 = vld [vmem:[%s1993_s0] sm:$0xff]  ;;  %v62_v53 = vlaneseq }
   0xe   :  { %367 = vmatprep.subr.bf16.mxu1 %v1661_v0  ;;  %v1508_v2 = vld [vmem:[#allocation2 + $0x70] ss:$8 sps:$4 sm:$0xff]   ;;  %214 = vmatprep.subr.bf16.mxu0 %v1506_v1  ;;  %v1509_v3 = vld [vmem:[#allocation2 + $0x64] ss:$8 sps:$4 sm:$0xff]   ;;  %v1511_v4 = vld [vmem:[#allocation2 + $0x60] ss:$8 sps:$4 sm:$0xff]   ;;  %v1304_v13 = vcombine.high %v1698_v12, %v1698_v12  ;;  %v1303_v41 = vcombine.low %v1698_v12, %v1698_v12 }
   0xf   :  { %215 = vmatpush1.bf16.msra.mxu0 %v1508_v2  ;;  %v1512_v5 = vld [vmem:[#allocation2 + $0x54] ss:$8 sps:$4 sm:$0xff]   ;;  %v1514_v6 = vld [vmem:[#allocation2 + $0x50] ss:$8 sps:$4 sm:$0xff]   ;;  %v1515_v7 = vld [vmem:[#allocation2 + $0x44] ss:$8 sps:$4 sm:$0xff]  }
  0x10   :  { %216 = vmatprep.subr.bf16.mxu0 %v1509_v3  ;;  %v1517_v8 = vld [vmem:[#allocation2 + $0x40] ss:$8 sps:$4 sm:$0xff]   ;;  %v1518_v9 = vld [vmem:[#allocation2 + $0x34] ss:$8 sps:$4 sm:$0xff]   ;;  %v1520_v10 = vld [vmem:[#allocation2 + $0x30] ss:$8 sps:$4 sm:$0xff]  }
  0x11   :  { %v1521_v11 = vld [vmem:[#allocation2 + $0x24] ss:$8 sps:$4 sm:$0xff]   ;;  %vm203_vm0 = vcmask 556032   ;;  %v1546_v14 = vld [vmem:[#allocation2 + $0x140] ss:$8 sps:$4 sm:$0xff]   ;;  %vm207_vm1 = vcmask 1041408  }
  0x12   :  { %v1523_v15 = vld [vmem:[#allocation2 + $0x20] ss:$8 sps:$4 sm:$0xff]   ;;  %v1524_v16 = vld [vmem:[#allocation2 + $0x14] ss:$8 sps:$4 sm:$0xff]   ;;  %1332 = vmatprep.mubr.msk.bf16.mxu0 %vm203_vm0, %v1304_v13  ;;  %368 = vmatpush1.bf16.msra.mxu1 %v1546_v14  ;;  %v1547_v17 = vld [vmem:[#allocation2 + $0x130] ss:$8 sps:$4 sm:$0xff]  }
  0x13   :  { %217 = vmatpush1.bf16.msra.mxu0 %v1511_v4  ;;  %369 = vmatprep.subr.bf16.mxu1 %v1661_v0  ;;  %v1526_v18 = vld [vmem:[#allocation2 + $0x10] ss:$8 sps:$4 sm:$0xff]   ;;  %v1527_v19 = vld [vmem:[#allocation2 + $0x4] ss:$8 sps:$4 sm:$0xff]   ;;  %v1548_v20 = vld [vmem:[#allocation2 + $0x120] ss:$8 sps:$4 sm:$0xff]  }
  0x14   :  { %218 = vmatprep.subr.bf16.mxu0 %v1512_v5  ;;  %v60_v21 = vld [vmem:[#allocation2 + $0xc0] sm:$0x33]  ;;  %v1549_v23 = vld [vmem:[#allocation2 + $0x110] ss:$8 sps:$4 sm:$0xff]   ;;  %v1532_v26 = vld [vmem:[#allocation2 + $0xb4] ss:$8 sps:$4 sm:$0xff]  }
  0x15   :  { %v1529_v22 = vld [vmem:[#allocation2] ss:$8 sps:$4 sm:$0xff]   ;;  %v1330_v24 = vcombine.high %v60_v21, %v60_v21  ;;  %v1329_v25 = vcombine.low %v60_v21, %v60_v21  ;;  %v1554_v28 = vld [vmem:[#allocation2 + $0x190] ss:$0 sps:$4 sm:$0xff]   ;;  %v1535_v31 = vld [vmem:[#allocation2 + $0xa4] ss:$8 sps:$4 sm:$0xff]  }
  0x16   :  { %370 = vmatpush1.bf16.msra.mxu1 %v1547_v17  ;;  %v1550_v27 = vld [vmem:[#allocation2 + $0x100] ss:$8 sps:$4 sm:$0xff]   ;;  %v1534_v30 = vld [vmem:[#allocation2 + $0xb0] ss:$8 sps:$4 sm:$0xff]   ;;  %vm363_vm2 = vcmask 1043456   ;;  %v1662_v48 = vmov 0.0  }
  0x17   :  { %219 = vmatpush1.bf16.msra.mxu0 %v1514_v6  ;;  %371 = vmatprep.subr.bf16.mxu1 %v1661_v0  ;;  %v209_v29 = vsel %vm207_vm1, %v1329_v25, 0  ;;  %v1551_v32 = vld [vmem:[#allocation2 + $0xf0] ss:$8 sps:$4 sm:$0xff]   ;;  %v1537_v33 = vld [vmem:[#allocation2 + $0xa0] ss:$8 sps:$4 sm:$0xff]   ;;  %v365_v34 = vsel %vm363_vm2, %v1554_v28, 0 }
  0x18   :  { %220 = vmatprep.subr.bf16.mxu0 %v1515_v7  ;;  %v1538_v35 = vld [vmem:[#allocation2 + $0x94] ss:$8 sps:$4 sm:$0xff]   ;;  %v1552_v36 = vld [vmem:[#allocation2 + $0xe0] ss:$8 sps:$4 sm:$0xff]   ;;  %v1540_v37 = vld [vmem:[#allocation2 + $0x90] ss:$8 sps:$4 sm:$0xff]  }
  0x19   :  { %v1541_v38 = vld [vmem:[#allocation2 + $0x84] ss:$8 sps:$4 sm:$0xff]   ;;  %v1553_v39 = vld [vmem:[#allocation2 + $0xd0] ss:$8 sps:$4 sm:$0xff]   ;;  %v1543_v40 = vld [vmem:[#allocation2 + $0x80] ss:$8 sps:$4 sm:$0xff]  }
  0x1a   :  { %372 = vmatpush1.bf16.msra.mxu1 %v1548_v20  ;;  %v1555_v42 = vld [vmem:[#allocation2 + $0x180] ss:$8 sps:$4 sm:$0xff]   ;;  %v1556_v43 = vld [vmem:[#allocation2 + $0x170] ss:$8 sps:$4 sm:$0xff]   ;;  %v1561_v46 = vld [vmem:[#allocation2 + $0x274] ss:$8 sps:$4 sm:$0xff]  }
  0x1b   :  { %221 = vmatpush1.bf16.msra.mxu0 %v1517_v8  ;;  %373 = vmatprep.subr.bf16.mxu1 %v1661_v0  ;;  %v1557_v44 = vld [vmem:[#allocation2 + $0x160] ss:$8 sps:$4 sm:$0xff]   ;;  %v1558_v45 = vld [vmem:[#allocation2 + $0x150] ss:$8 sps:$4 sm:$0xff]   ;;  %v63_v54 = vshrl.u32 %v62_v53, 7  ;;  %vm359_vm3 = vcmask 588800  }
  0x1c   :  { %222 = vmatprep.subr.bf16.mxu0 %v1518_v9  ;;  %v1599_v47 = vld [vmem:[#allocation2 + $0x1f0] ss:$0 sps:$4 sm:$0x33]   ;;  %v1600_v50 = vld [vmem:[#allocation2 + $0x1e0] ss:$8 sps:$4 sm:$0xff]   ;;  %vm1663_vm4 = vmmov 0  }
  0x1d   :  { %v458_v49 = vsel %vm207_vm1, %v1599_v47, 0  ;;  %v1601_v51 = vld [vmem:[#allocation2 + $0x1d0] ss:$8 sps:$4 sm:$0xff]   ;;  %v1602_v52 = vld [vmem:[#allocation2 + $0x1c0] ss:$8 sps:$4 sm:$0xff]   ;;  %v1726_v55 = vsub.s32 0, %v63_v54 }
  0x1e   :  { %374 = vmatpush1.bf16.msra.mxu1 %v1549_v23  ;;  %v33_v56 = vld [vmem:[%s1996_s3] ss:$8 sm:$0x3]  ;;  %v1731_v57 = vsub.s32 1, %v63_v54  ;;  %v1559_v7 = vld [vmem:[#allocation2 + $0x270] ss:$8 sps:$4 sm:$0xff]  }
  0x1f   :  { %223 = vmatpush1.bf16.msra.mxu0 %v1520_v10  ;;  %375 = vmatprep.subr.bf16.mxu1 %v1661_v0  ;;  %v65_v58 = vrot.slane %v33_v56, %v1726_v55  ;;  %v1738_v3 = vld [vmem:[%s1993_s0 + $0x8] sm:$0xff]  ;;  %v1567_v12 = vld [vmem:[#allocation2 + $0x254] ss:$8 sps:$4 sm:$0xff]   ;;  %v1565_v13 = vld [vmem:[#allocation2 + $0x250] ss:$8 sps:$4 sm:$0xff]   ;;  %vm453_vm5 = vcmask 687104  }
  0x20   :  { %224 = vmatprep.subr.bf16.mxu0 %v1521_v11  ;;  %v69_v59 = vrot.slane %v33_v56, %v1731_v57  ;;  %v1357_v8 = vcombine.high %v1738_v3, %v1738_v3  ;;  %v1564_v10 = vld [vmem:[#allocation2 + $0x264] ss:$8 sps:$4 sm:$0xff]   ;;  %v1562_v11 = vld [vmem:[#allocation2 + $0x260] ss:$8 sps:$4 sm:$0xff]   ;;  %v1571_v17 = vld [vmem:[#allocation2 + $0x230] ss:$8 sps:$4 sm:$0xff]  }
  0x21   :  { %v1570_v14 = vld [vmem:[#allocation2 + $0x244] ss:$8 sps:$4 sm:$0xff]   ;;  %v1579_v20 = vld [vmem:[#allocation2 + $0x214] ss:$8 sps:$4 sm:$0xff]   ;;  %v1577_v21 = vld [vmem:[#allocation2 + $0x210] ss:$8 sps:$4 sm:$0xff]  }
  0x22   :  { %376 = vmatpush1.bf16.msra.mxu1 %v1550_v27  ;;  %v543_v23 = vld [vmem:[#allocation2 + $0x2c0] sm:$0x33]  ;;  %v1587_v28 = vld [vmem:[#allocation2 + $0x2b4] ss:$8 sps:$4 sm:$0xff]   ;;  %v1610_v53 = vld [vmem:[#allocation2 + $0x2f0] ss:$8 sps:$4 sm:$0xff]  }
  0x23   :  { %225 = vmatpush1.bf16.msra.mxu0 %v1523_v15  ;;  %377 = vmatprep.subr.bf16.mxu1 %v1661_v0  ;;  %v1568_v15 = vld [vmem:[#allocation2 + $0x240] ss:$8 sps:$4 sm:$0xff]   ;;  %v1383_v25 = vcombine.high %v543_v23, %v543_v23  ;;  %v1612_v56 = vld [vmem:[#allocation2 + $0x2d0] ss:$8 sps:$4 sm:$0xff]   ;;  %vm500_vm6 = vcmask 80896   ;;  %s1664_s8 = smov 10  }
  0x24   :  { %226 = vmatprep.subr.bf16.mxu0 %v1524_v16  ;;  %v1573_v16 = vld [vmem:[#allocation2 + $0x234] ss:$8 sps:$4 sm:$0xff]   ;;  %v1611_v54 = vld [vmem:[#allocation2 + $0x2e0] ss:$8 sps:$4 sm:$0xff]   ;;  %vm1013_vm7 = vcmask 162816   ;;  %vm1295_vm8 = vcmask 171008  }
  0x26   :  { %378 = vmatpush1.bf16.msra.mxu1 %v1551_v32  ;;  %v1593_v32 = vld [vmem:[#allocation2 + $0x294] ss:$8 sps:$4 sm:$0xff]  }
  0x27   :  { %227 = vmatpush1.bf16.msra.mxu0 %v1526_v18  ;;  %379 = vmatprep.subr.bf16.mxu1 %v1661_v0  ;;  %v1576_v18 = vld [vmem:[#allocation2 + $0x224] ss:$8 sps:$4 sm:$0xff]  }
  0x28   :  { %228 = vmatprep.subr.bf16.mxu0 %v1527_v19  ;;  %v1574_v19 = vld [vmem:[#allocation2 + $0x220] ss:$8 sps:$4 sm:$0xff]  }
  0x2a   :  { %380 = vmatpush1.bf16.msra.mxu1 %v1552_v36  ;;  %v1356_v36 = vcombine.low %v1738_v3, %v1738_v3 }
  0x2b   :  { %229 = vmatpush1.bf16.msra.mxu0 %v1529_v22  ;;  %381 = vmatprep.subr.bf16.mxu1 %v1661_v0  ;;  %v1582_v22 = vld [vmem:[#allocation2 + $0x204] ss:$8 sps:$4 sm:$0xff]  }
  0x2c   :  { %1331 = vmatprep.subr.msk.bf16.mxu0 %vm207_vm1, %v1330_v24  ;;  %v1580_v24 = vld [vmem:[#allocation2 + $0x200] ss:$8 sps:$4 sm:$0xff]  }
  0x2e   :  { %382 = vmatpush1.bf16.msra.mxu1 %v1553_v39  ;;  %v34_v39 = vld [vmem:[%s1996_s3 + $0x1] ss:$0 sm:$0xff] }
  0x2f   :  { %237 = vmatpush2.bf16.msra.mxu0 %v209_v29  ;;  %389 = vmatprep.subr.bf16.mxu1 %v1661_v0  ;;  %v1585_v29 = vld [vmem:[#allocation2 + $0x2b0] ss:$8 sps:$4 sm:$0xff]  }
  0x30   :  { %238 = vmatprep.subr.bf16.mxu0 %v1532_v26  ;;  %v1382_v26 = vcombine.low %v543_v23, %v543_v23 }
  0x32   :  { %390 = vmatpush2.bf16.msra.mxu1 %v365_v34  ;;  %v690_v27 = vsel %vm207_vm1, %v1382_v26, 0  ;;  %v1596_v34 = vld [vmem:[#allocation2 + $0x284] ss:$8 sps:$4 sm:$0xff]  }
  0x33   :  { %239 = vmatpush2.bf16.msra.mxu0 %v1534_v30  ;;  %391 = vmatprep.subr.bf16.mxu1 %v1661_v0  ;;  %v1590_v30 = vld [vmem:[#allocation2 + $0x2a4] ss:$8 sps:$4 sm:$0xff]  }
  0x34   :  { %240 = vmatprep.subr.bf16.mxu0 %v1535_v31  ;;  %v1588_v31 = vld [vmem:[#allocation2 + $0x2a0] ss:$8 sps:$4 sm:$0xff]  }
  0x36   :  { %392 = vmatpush2.bf16.msra.mxu1 %v1555_v42 }
  0x37   :  { %241 = vmatpush2.bf16.msra.mxu0 %v1537_v33  ;;  %393 = vmatprep.subr.bf16.mxu1 %v1661_v0  ;;  %v1591_v33 = vld [vmem:[#allocation2 + $0x290] ss:$8 sps:$4 sm:$0xff]  }
  0x38   :  { %242 = vmatprep.subr.bf16.mxu0 %v1538_v35  ;;  %v1594_v35 = vld [vmem:[#allocation2 + $0x280] ss:$8 sps:$4 sm:$0xff]  }
  0x3a   :  { %394 = vmatpush2.bf16.msra.mxu1 %v1556_v43 }
  0x3b   :  { %243 = vmatpush2.bf16.msra.mxu0 %v1540_v37  ;;  %395 = vmatprep.subr.bf16.mxu1 %v1661_v0  ;;  %v1603_v37 = vld [vmem:[#allocation2 + $0x1b0] ss:$8 sps:$4 sm:$0xff]  }
  0x3c   :  { %244 = vmatprep.subr.bf16.mxu0 %v1541_v38  ;;  %v1604_v38 = vld [vmem:[#allocation2 + $0x1a0] ss:$8 sps:$4 sm:$0xff]  }
  0x3e   :  { %396 = vmatpush2.bf16.msra.mxu1 %v1557_v44 }
  0x3f   :  { %245 = vmatpush2.bf16.msra.mxu0 %v1543_v40  ;;  %397 = vmatprep.subr.bf16.mxu1 %v1661_v0 }
  0x40   :  { %1441 = vmatprep.subr.bf16.mxu0 %v1662_v48 }
  0x42   :  { %247 = vmatmul.mubr.bf16.vlgmr.msra.gmra.mxu0 %v1303_v41  ;;  %398 = vmatpush2.bf16.msra.mxu1 %v1558_v45  ;;  %v1605_v45 = vld [vmem:[#allocation2 + $0x340] ss:$8 sps:$4 sm:$0xff]  }
  0x43   :  { %695 = vmatprep.subr.bf16.mxu1 %v1561_v46  ;;  %1442 = vmatpush3.bf16.msra.mxu0 %v458_v49  ;;  %v1606_v49 = vld [vmem:[#allocation2 + $0x330] ss:$8 sps:$4 sm:$0xff]  }
  0x44   :  { %1443 = vmatprep.subr.bf16.mxu0 %v1662_v48  ;;  %1453 = vmatprep.mubr.msk.bf16.mxu0 %vm1663_vm4, %v1662_v48 }
  0x47   :  { %1444 = vmatpush3.bf16.msra.mxu0 %v1600_v50  ;;  %v1607_v50 = vld [vmem:[#allocation2 + $0x320] ss:$8 sps:$4 sm:$0xff]  }
  0x48   :  { %1445 = vmatprep.subr.bf16.mxu0 %v1662_v48 }
  0x4b   :  { %1446 = vmatpush3.bf16.msra.mxu0 %v1601_v51  ;;  %v1608_v51 = vld [vmem:[#allocation2 + $0x310] ss:$8 sps:$4 sm:$0xff]  }
  0x4c   :  { %1447 = vmatprep.subr.bf16.mxu0 %v1662_v48 }
  0x4f   :  { %1448 = vmatpush3.bf16.msra.mxu0 %v1602_v52  ;;  %v1609_v52 = vld [vmem:[#allocation2 + $0x300] ss:$8 sps:$4 sm:$0xff]  }
  0x50   :  { %1449 = vmatprep.subr.bf16.mxu0 %v1662_v48 }
  0x53   :  { %1450 = vmatpush3.bf16.msra.mxu0 %v1603_v37 }
  0x54   :  { %1451 = vmatprep.subr.bf16.mxu0 %v1662_v48 }
  0x57   :  { %1452 = vmatpush3.bf16.msra.mxu0 %v1604_v38 }
  0x58   :  { %846 = vmatprep.subr.bf16.mxu0 %v1661_v0 }
 0x102   :  { %v248_v60 = vpop.f32.mrf.mxu0 }
 0x103   :  { %v249_v61 = vadd.f32 %v248_v60, %v65_v58  ;;  %v1613_v58 = vld [vmem:[#allocation2 + $0x390] ss:$0 sps:$4 sm:$0xff]   ;;  %v1614_v60 = vld [vmem:[#allocation2 + $0x380] ss:$8 sps:$4 sm:$0xff]  }
 0x104   :  { %v250_v62 = vpop.f32.mrf.mxu0 }
 0x105   :  { %v251_v63 = vadd.f32 %v250_v62, %v69_v59  ;;  %v255_v1 = vmax.f32 %v249_v61, 0.0  ;;  %v844_v59 = vsel %vm363_vm2, %v1613_v58, 0  ;;  %v1615_v61 = vld [vmem:[#allocation2 + $0x370] ss:$8 sps:$4 sm:$0xff]  }
 0x106   :  { %v252_v2 = vpop.f32.mrf.mxu0  ;;  %v1355_v62 = vld [vmem:[%s1996_s3 + $0x3] ss:$8 sm:$0x3]  ;;  %v996_v58 = vld [vmem:[%s1995_s2 + $0x10] sm:$0xff] }
 0x107   :  { %v256_v4 = vmax.f32 %v251_v63, 0.0  ;;  %v257_v9 = vpack.c.bf16 %v255_v1, %v255_v1  ;;  %v1616_v63 = vld [vmem:[#allocation2 + $0x360] ss:$8 sps:$4 sm:$0xff]   ;;  %v548_v1 = vrot.slane %v1355_v62, %v1726_v55  ;;  %v552_v2 = vrot.slane %v1355_v62, %v1731_v57 }
 0x108   :  { %v253_v5 = vpop.f32.mrf.mxu0  ;;  %v1111_v62 = vld [vmem:[%s1995_s2 + $0x120] sm:$0xff] }
 0x109   :  { %v258_v6 = vpack.c.bf16 %v256_v4, %v256_v4  ;;  %v1617_v4 = vld [vmem:[#allocation2 + $0x350] ss:$8 sps:$4 sm:$0xff]  }
 0x10b   :  { %1346 = vmatprep.mubr.msk.bf16.mxu1 %vm359_vm3, %v258_v6 }
 0x10c   :  { %400 = vmatmul.mubr.bf16.vlgmr.msra.gmra.mxu1 %v257_v9 }
 0x10d   :  { %696 = vmatpush1.bf16.msra.mxu1 %v1559_v7  ;;  %1385 = vmatprep.mubr.msk.bf16.mxu1 %vm203_vm0, %v1357_v8 }
 0x10e   :  { %697 = vmatprep.subr.bf16.mxu1 %v1564_v10 }
 0x111   :  { %698 = vmatpush1.bf16.msra.mxu1 %v1562_v11 }
 0x112   :  { %699 = vmatprep.subr.bf16.mxu1 %v1567_v12 }
 0x115   :  { %700 = vmatpush1.bf16.msra.mxu1 %v1565_v13 }
 0x116   :  { %701 = vmatprep.subr.bf16.mxu1 %v1570_v14  ;;  %v1618_v14 = vld [vmem:[#allocation2 + $0x3f0] ss:$0 sps:$4 sm:$0x33]  }
 0x119   :  { %702 = vmatpush1.bf16.msra.mxu1 %v1568_v15  ;;  %v936_v15 = vsel %vm207_vm1, %v1618_v14, 0  ;;  %v1098_v14 = vld [vmem:[%s1995_s2 + $0x50] sm:$0xff] }
 0x11a   :  { %703 = vmatprep.subr.bf16.mxu1 %v1573_v16  ;;  %v1619_v16 = vld [vmem:[#allocation2 + $0x3e0] ss:$8 sps:$4 sm:$0xff]  }
 0x11d   :  { %704 = vmatpush1.bf16.msra.mxu1 %v1571_v17  ;;  %v1621_v17 = vld [vmem:[#allocation2 + $0x3c0] ss:$8 sps:$4 sm:$0xff]  }
 0x11e   :  { %705 = vmatprep.subr.bf16.mxu1 %v1576_v18  ;;  %v1622_v18 = vld [vmem:[#allocation2 + $0x3b0] ss:$8 sps:$4 sm:$0xff]  }
 0x121   :  { %706 = vmatpush1.bf16.msra.mxu1 %v1574_v19  ;;  %v1623_v19 = vld [vmem:[#allocation2 + $0x3a0] ss:$8 sps:$4 sm:$0xff]  }
 0x122   :  { %707 = vmatprep.subr.bf16.mxu1 %v1579_v20 }
 0x125   :  { %708 = vmatpush1.bf16.msra.mxu1 %v1577_v21 }
 0x126   :  { %709 = vmatprep.subr.bf16.mxu1 %v1582_v22 }
 0x129   :  { %710 = vmatpush1.bf16.msra.mxu1 %v1580_v24  ;;  %v516_v24 = vld [vmem:[%s1996_s3 + $0x4] ss:$0 sm:$0xff] }
 0x12a   :  { %1384 = vmatprep.subr.msk.bf16.mxu1 %vm207_vm1, %v1383_v25 }
 0x12d   :  { %718 = vmatpush2.bf16.msra.mxu1 %v690_v27 }
 0x12e   :  { %719 = vmatprep.subr.bf16.mxu1 %v1587_v28 }
 0x131   :  { %720 = vmatpush2.bf16.msra.mxu1 %v1585_v29 }
 0x132   :  { %721 = vmatprep.subr.bf16.mxu1 %v1590_v30 }
 0x135   :  { %722 = vmatpush2.bf16.msra.mxu1 %v1588_v31 }
 0x136   :  { %723 = vmatprep.subr.bf16.mxu1 %v1593_v32  ;;  %v517_v32 = vld [vmem:[%s1996_s3 + $0x5] ss:$0 sm:$0xff] }
 0x139   :  { %724 = vmatpush2.bf16.msra.mxu1 %v1591_v33  ;;  %v35_v33 = vld [vmem:[%s1996_s3 + $0x2] ss:$0 sm:$0xff] }
 0x13a   :  { %725 = vmatprep.subr.bf16.mxu1 %v1596_v34 }
 0x13d   :  { %726 = vmatpush2.bf16.msra.mxu1 %v1594_v35 }
 0x13e   :  { %1457 = vmatprep.subr.bf16.mxu1 %v1662_v48 }
 0x140   :  { %728 = vmatmul.mubr.bf16.vlgmr.msra.gmra.mxu1 %v1356_v36 }
 0x141   :  { %1469 = vmatprep.mubr.msk.bf16.mxu1 %vm1663_vm4, %v1662_v48  ;;  %1458 = vmatpush3.bf16.msra.mxu1 %v936_v15  ;;  %v1097_v15 = vld [vmem:[%s1995_s2 + $0x40] sm:$0xff] }
 0x142   :  { %1459 = vmatprep.subr.bf16.mxu1 %v1662_v48 }
 0x145   :  { %1460 = vmatpush3.bf16.msra.mxu1 %v1619_v16  ;;  %v1096_v16 = vld [vmem:[%s1995_s2 + $0x30] sm:$0xff] }
 0x146   :  { %1461 = vmatprep.subr.bf16.mxu1 %v1662_v48 }
 0x1cc   :  { %v401_v40 = vpop.f32.mrf.mxu1 }
 0x1cd   :  { %v402_v41 = vadd.f32 %v401_v40, %v34_v39 }
 0x1ce   :  { %v403_v42 = vpop.f32.mrf.mxu1 }
 0x1cf   :  { %v407_v43 = vmax.f32 %v402_v41, 0.0 }
 0x1d0   :  { %v404_v44 = vpop.f32.mrf.mxu1 }
 0x1d1   :  { %v408_v46 = vpack.c.bf16 %v407_v43, %v407_v43 }
 0x1d2   :  { %v405_v47 = vpop.f32.mrf.mxu1 }
 0x1d3   :  { %1454 = vmatmul.mubr.msk.bf16.vlgmr.msra.gmra.mxu0 %vm453_vm5, %v408_v46 }
 0x1d4   :  { %847 = vmatpush1.bf16.msra.mxu0 %v1605_v45 }
 0x1d5   :  { %848 = vmatprep.subr.bf16.mxu0 %v1661_v0 }
 0x1d8   :  { %849 = vmatpush1.bf16.msra.mxu0 %v1606_v49 }
 0x1d9   :  { %850 = vmatprep.subr.bf16.mxu0 %v1661_v0 }
 0x1dc   :  { %851 = vmatpush1.bf16.msra.mxu0 %v1607_v50 }
 0x1dd   :  { %852 = vmatprep.subr.bf16.mxu0 %v1661_v0 }
 0x1e0   :  { %853 = vmatpush1.bf16.msra.mxu0 %v1608_v51 }
 0x1e1   :  { %854 = vmatprep.subr.bf16.mxu0 %v1661_v0 }
 0x1e4   :  { %855 = vmatpush1.bf16.msra.mxu0 %v1609_v52 }
 0x1e5   :  { %856 = vmatprep.subr.bf16.mxu0 %v1661_v0 }
 0x1e8   :  { %857 = vmatpush1.bf16.msra.mxu0 %v1610_v53  ;;  %v999_v53 = vld [vmem:[%s1995_s2 + $0x28] sm:$0xf] }
 0x1e9   :  { %858 = vmatprep.subr.bf16.mxu0 %v1661_v0 }
 0x1ec   :  { %859 = vmatpush1.bf16.msra.mxu0 %v1611_v54  ;;  %v998_v54 = vld [vmem:[%s1995_s2 + $0x20] sm:$0xf] }
 0x1ed   :  { %860 = vmatprep.subr.bf16.mxu0 %v1661_v0 }
 0x1f0   :  { %861 = vmatpush1.bf16.msra.mxu0 %v1612_v56  ;;  %v997_v56 = vld [vmem:[%s1995_s2 + $0x18] sm:$0xff] }
 0x1f1   :  { %868 = vmatprep.subr.bf16.mxu0 %v1661_v0 }
 0x1f4   :  { %869 = vmatpush2.bf16.msra.mxu0 %v844_v59  ;;  %v995_v59 = vld [vmem:[%s1995_s2 + $0x8] sm:$0xff] }
 0x1f5   :  { %870 = vmatprep.subr.bf16.mxu0 %v1661_v0 }
 0x1f8   :  { %871 = vmatpush2.bf16.msra.mxu0 %v1614_v60  ;;  %v994_v60 = vld [vmem:[%s1995_s2] sm:$0xff] }
 0x1f9   :  { %872 = vmatprep.subr.bf16.mxu0 %v1661_v0 }
 0x1fc   :  { %873 = vmatpush2.bf16.msra.mxu0 %v1615_v61 }
 0x1fd   :  { %874 = vmatprep.subr.bf16.mxu0 %v1661_v0 }
 0x200   :  { %v729_v3 = vpop.f32.mrf.mxu1  ;;  %875 = vmatpush2.bf16.msra.mxu0 %v1616_v63  ;;  %v1110_v63 = vld [vmem:[%s1995_s2 + $0x110] sm:$0xff] }
 0x201   :  { %v730_v5 = vadd.f32 %v729_v3, %v548_v1  ;;  %876 = vmatprep.subr.bf16.mxu0 %v1661_v0  ;;  %v1620_v0 = vld [vmem:[#allocation2 + $0x3d0] ss:$8 sps:$4 sm:$0xff]   ;;  %v1109_v1 = vld [vmem:[%s1995_s2 + $0x100] sm:$0xff] }
 0x202   :  { %v731_v6 = vpop.f32.mrf.mxu1  ;;  %1462 = vmatpush3.bf16.msra.mxu1 %v1620_v0  ;;  %v1107_v3 = vld [vmem:[%s1995_s2 + $0xe0] sm:$0xff]  ;;  %v1120_v0 = vld [vmem:[%s1995_s2 + $0x1b0] sm:$0xff] }
 0x203   :  { %v732_v7 = vadd.f32 %v731_v6, %v552_v2  ;;  %v736_v8 = vmax.f32 %v730_v5, 0.0  ;;  %1463 = vmatprep.subr.bf16.mxu1 %v1662_v48  ;;  %v1108_v2 = vld [vmem:[%s1995_s2 + $0xf0] sm:$0xff] }
 0x204   :  { %v733_v9 = vpop.f32.mrf.mxu1  ;;  %877 = vmatpush2.bf16.msra.mxu0 %v1617_v4  ;;  %v1106_v4 = vld [vmem:[%s1995_s2 + $0xd0] sm:$0xff] }
 0x205   :  { %v737_v10 = vmax.f32 %v732_v7, 0.0  ;;  %v738_v13 = vpack.c.bf16 %v736_v8, %v736_v8  ;;  %1408 = vmatprep.subr.msk.mxu0 %vm363_vm2, %v999_v53  ;;  %v1105_v7 = vld [vmem:[%s1995_s2 + $0xc0] sm:$0xff]  ;;  %v1104_v8 = vld [vmem:[%s1995_s2 + $0xb0] sm:$0xff] }
 0x206   :  { %v734_v11 = vpop.f32.mrf.mxu1  ;;  %1464 = vmatpush3.bf16.msra.mxu1 %v1621_v17  ;;  %v1103_v9 = vld [vmem:[%s1995_s2 + $0xa0] sm:$0xff] }
 0x207   :  { %v739_v12 = vpack.c.bf16 %v737_v10, %v737_v10  ;;  %1465 = vmatprep.subr.bf16.mxu1 %v1662_v48  ;;  %v1102_v10 = vld [vmem:[%s1995_s2 + $0x90] sm:$0xff]  ;;  %v1101_v11 = vld [vmem:[%s1995_s2 + $0x80] sm:$0xff] }
 0x208   :  { %v1119_v17 = vld [vmem:[%s1995_s2 + $0x1a0] sm:$0xff] }
 0x209   :  { %1399 = vmatprep.mubr.msk.bf16.mxu0 %vm359_vm3, %v739_v12  ;;  %v1100_v12 = vld [vmem:[%s1995_s2 + $0x70] sm:$0xff] }
 0x20a   :  { %879 = vmatmul.mubr.bf16.vlgmr.msra.gmra.mxu0 %v738_v13  ;;  %1466 = vmatpush3.bf16.msra.mxu1 %v1622_v18  ;;  %v1099_v13 = vld [vmem:[%s1995_s2 + $0x60] sm:$0xff]  ;;  %v1118_v18 = vld [vmem:[%s1995_s2 + $0x190] sm:$0xff] }
 0x20b   :  { %1087 = vmatprep.mubr.f32.mxu0 %v1662_v48  ;;  %1467 = vmatprep.subr.bf16.mxu1 %v1662_v48 }
 0x20c   :  { %1409 = vmatpush1.msk.msra.mxu0 %vm363_vm2, %v998_v54  ;;  %v1207_v54 = vld [vmem:[%s1996_s3 + $0x10] ss:$0 sm:$0xff] }
 0x20d   :  { %1051 = vmatprep.subr.mxu0 %v997_v56 }
 0x20e   :  { %1468 = vmatpush3.bf16.msra.mxu1 %v1623_v19  ;;  %1052 = vmatpush1.msra.mxu0 %v996_v58  ;;  %v1117_v19 = vld [vmem:[%s1995_s2 + $0x180] sm:$0xff] }
 0x20f   :  { %1125 = vmatprep.subr.mxu1 %v1662_v48  ;;  %1053 = vmatprep.subr.mxu0 %v995_v59 }
 0x210   :  { %1054 = vmatpush1.msra.mxu0 %v994_v60 }
 0x211   :  { %1473 = vmatprep.subr.mxu0 %v1662_v48 }
 0x293   :  { %v494_v20 = vpop.f32.mrf.mxu0 }
 0x294   :  { %v495_v37 = vadd.f32 %v494_v20, %v35_v33  ;;  %v1116_v20 = vld [vmem:[%s1995_s2 + $0x170] sm:$0xff] }
 0x295   :  { %v1455_v21 = vpop.f32.mrf.mxu0  ;;  %v1203_v33 = vld [vmem:[%s1995_s2 + $0x230] sm:$0xff] }
 0x296   :  { %v501_v41 = vsel %vm500_vm6, %v495_v37, -inf }
 0x297   :  { %v497_v22 = vpop.f32.mrf.mxu0 }
 0x299   :  { %v1456_v23 = vpop.f32.mrf.mxu0 }
 0x2ca   :  { %v880_v25 = vpop.f32.mrf.mxu0 }
 0x2cb   :  { %v881_v26 = vadd.f32 %v880_v25, %v516_v24 }
 0x2cc   :  { %v882_v27 = vpop.f32.mrf.mxu0 }
 0x2cd   :  { %v886_v28 = vmax.f32 %v881_v26, 0.0  ;;  %v1115_v26 = vld [vmem:[%s1995_s2 + $0x160] sm:$0xff]  ;;  %v1114_v27 = vld [vmem:[%s1995_s2 + $0x150] sm:$0xff] }
 0x2ce   :  { %v883_v29 = vpop.f32.mrf.mxu0 }
 0x2cf   :  { %v887_v30 = vpack.c.bf16 %v886_v28, %v886_v28  ;;  %v1113_v28 = vld [vmem:[%s1995_s2 + $0x140] sm:$0xff]  ;;  %v1112_v29 = vld [vmem:[%s1995_s2 + $0x130] sm:$0xff] }
 0x2d0   :  { %v884_v31 = vpop.f32.mrf.mxu0 }
 0x2d1   :  { %1470 = vmatmul.mubr.msk.bf16.vlgmr.msra.gmra.mxu1 %vm453_vm5, %v887_v30  ;;  %v1206_v30 = vld [vmem:[%s1995_s2 + $0x260] sm:$0xf]  ;;  %v1205_v31 = vld [vmem:[%s1995_s2 + $0x250] sm:$0xff] }
 0x2d2   :  { %1126 = vmatpush1.msra.mxu1 %v1111_v62 }
 0x2d3   :  { %1127 = vmatprep.subr.mxu1 %v1662_v48 }
 0x2d4   :  { %1128 = vmatpush1.msra.mxu1 %v1110_v63 }
 0x2d5   :  { %1129 = vmatprep.subr.mxu1 %v1662_v48 }
 0x2d6   :  { %1130 = vmatpush1.msra.mxu1 %v1109_v1 }
 0x2d7   :  { %1131 = vmatprep.subr.mxu1 %v1662_v48 }
 0x2d8   :  { %1132 = vmatpush1.msra.mxu1 %v1108_v2 }
 0x2d9   :  { %1133 = vmatprep.subr.mxu1 %v1662_v48 }
 0x2da   :  { %1134 = vmatpush1.msra.mxu1 %v1107_v3 }
 0x2db   :  { %1135 = vmatprep.subr.mxu1 %v1662_v48 }
 0x2dc   :  { %1136 = vmatpush1.msra.mxu1 %v1106_v4 }
 0x2dd   :  { %1137 = vmatprep.subr.mxu1 %v1662_v48 }
 0x2de   :  { %1138 = vmatpush1.msra.mxu1 %v1105_v7 }
 0x2df   :  { %1139 = vmatprep.subr.mxu1 %v1662_v48 }
 0x2e0   :  { %1140 = vmatpush1.msra.mxu1 %v1104_v8 }
 0x2e1   :  { %1141 = vmatprep.subr.mxu1 %v1662_v48 }
 0x2e2   :  { %1142 = vmatpush1.msra.mxu1 %v1103_v9 }
 0x2e3   :  { %1143 = vmatprep.subr.mxu1 %v1662_v48 }
 0x2e4   :  { %1144 = vmatpush1.msra.mxu1 %v1102_v10 }
 0x2e5   :  { %1145 = vmatprep.subr.mxu1 %v1662_v48 }
 0x2e6   :  { %1146 = vmatpush1.msra.mxu1 %v1101_v11 }
 0x2e7   :  { %1147 = vmatprep.subr.mxu1 %v1662_v48 }
 0x2e8   :  { %1148 = vmatpush1.msra.mxu1 %v1100_v12 }
 0x2e9   :  { %1149 = vmatprep.subr.mxu1 %v1662_v48 }
 0x2ea   :  { %1150 = vmatpush1.msra.mxu1 %v1099_v13 }
 0x2eb   :  { %1151 = vmatprep.subr.mxu1 %v1662_v48 }
 0x2ec   :  { %1152 = vmatpush1.msra.mxu1 %v1098_v14 }
 0x2ed   :  { %1153 = vmatprep.subr.mxu1 %v1662_v48 }
 0x2ee   :  { %1154 = vmatpush1.msra.mxu1 %v1097_v15 }
 0x2ef   :  { %1155 = vmatprep.subr.mxu1 %v1662_v48 }
 0x2f0   :  { %1156 = vmatpush1.msra.mxu1 %v1096_v16 }
 0x2f1   :  { %1171 = vmatprep.subr.mxu1 %v1662_v48 }
 0x2f2   :  { %1172 = vmatpush2.msra.mxu1 %v1120_v0 }
 0x2f3   :  { %1173 = vmatprep.subr.mxu1 %v1662_v48 }
 0x2f4   :  { %1174 = vmatpush2.msra.mxu1 %v1119_v17 }
 0x2f5   :  { %1175 = vmatprep.subr.mxu1 %v1662_v48 }
 0x2f6   :  { %1176 = vmatpush2.msra.mxu1 %v1118_v18 }
 0x2f7   :  { %1177 = vmatprep.subr.mxu1 %v1662_v48 }
 0x2f8   :  { %1178 = vmatpush2.msra.mxu1 %v1117_v19 }
 0x2f9   :  { %1179 = vmatprep.subr.mxu1 %v1662_v48 }
 0x2fa   :  { %1180 = vmatpush2.msra.mxu1 %v1116_v20 }
 0x2fb   :  { %1181 = vmatprep.subr.mxu1 %v1662_v48 }
 0x2fc   :  { %1182 = vmatpush2.msra.mxu1 %v1115_v26 }
 0x2fd   :  { %1183 = vmatprep.subr.mxu1 %v1662_v48 }
 0x2fe   :  { %1184 = vmatpush2.msra.mxu1 %v1114_v27 }
 0x2ff   :  { %1185 = vmatprep.subr.mxu1 %v1662_v48 }
 0x300   :  { %1186 = vmatpush2.msra.mxu1 %v1113_v28 }
 0x301   :  { %1187 = vmatprep.subr.mxu1 %v1662_v48 }
 0x302   :  { %1188 = vmatpush2.msra.mxu1 %v1112_v29 }
 0x391   :  { %v972_v34 = vpop.f32.mrf.mxu1 }
 0x392   :  { %v973_v35 = vadd.f32 %v972_v34, %v517_v32  ;;  %v1204_v32 = vld [vmem:[%s1995_s2 + $0x240] sm:$0xff] }
 0x393   :  { %v1471_v36 = vpop.f32.mrf.mxu1  ;;  %v1202_v34 = vld [vmem:[%s1995_s2 + $0x220] sm:$0xff] }
 0x394   :  { %v978_v38 = vsel %vm500_vm6, %v973_v35, -inf  ;;  %v1200_v36 = vld [vmem:[%s1995_s2 + $0x200] sm:$0xff] }
 0x395   :  { %979 = vmax.xlane.f32.xlu0 %v978_v38  ;;  %v975_v39 = vpop.f32.mrf.mxu1  ;;  %v1407_v38 = vld [vmem:[%s1996_s3 + $0x6] ss:$8 sm:$0x3] }
 0x396   :  { %v1006_v39 = vrot.slane %v1407_v38, %v1726_v55  ;;  %v1197_v55 = vld [vmem:[%s1995_s2 + $0x1d0] sm:$0xff] }
 0x397   :  { %v1472_v40 = vpop.f32.mrf.mxu1 }
 0x398   :  { %v1010_v40 = vrot.slane %v1407_v38, %v1731_v57  ;;  %v1196_v57 = vld [vmem:[%s1995_s2 + $0x1c0] sm:$0xff] }
 0x399   :  { %502 = vmax.xlane.f32.xlu0 %v501_v41 }
 0x41e   :  { %v980_v42 = vpop.xlane.xlu0 %979 }
 0x41f   :  { %v981_v43 = vsub.f32 %v973_v35, %v980_v42  ;;  %v1201_v35 = vld [vmem:[%s1995_s2 + $0x210] sm:$0xff] }
 0x421   :  { %v982_v44 = vmul.f32 1.442695, %v981_v43 }
 0x422   :  { %v503_v45 = vpop.xlane.xlu0 %502 }
 0x423   :  { %1624 = vpow2.f32 %v982_v44  ;;  %v504_v46 = vsub.f32 %v495_v37, %v503_v45  ;;  %v1199_v37 = vld [vmem:[%s1995_s2 + $0x1f0] sm:$0xff] }
 0x425   :  { %v505_v47 = vmul.f32 1.442695, %v504_v46 }
 0x427   :  { %1626 = vpow2.f32 %v505_v47  ;;  %v1198_v47 = vld [vmem:[%s1995_s2 + $0x1e0] sm:$0xff]  ;;  %s1665_s2 = smov 20  }
 0x430   :  { %v1625_v49 = vpop.eup %1624 }
 0x431   :  { %v984_v50 = vsel %vm500_vm6, %v1625_v49, 0.0 }
 0x432   :  { %985 = vadd.xlane.f32.xlu1 %v984_v50 }
 0x434   :  { %v1799_v51 = vpop.eup %1626 }
 0x435   :  { %v507_v52 = vsel %vm500_vm6, %v1799_v51, 0.0 }
 0x436   :  { %508 = vadd.xlane.f32.xlu1 %v507_v52 }
 0x4bb   :  { %v986_v61 = vpop.xlane.xlu1 %985 }
 0x4bc   :  { %1628 = vrcp.f32 %v986_v61 }
 0x4bf   :  { %v509_v21 = vpop.xlane.xlu1 %508 }
 0x4c0   :  { %1630 = vrcp.f32 %v509_v21 }
 0x4c9   :  { %v1629_v5 = vpop.eup %1628 }
 0x4ca   :  { %v988_v6 = vmul.f32 %v1629_v5, %v1625_v49  ;;  %v1121_v49 = vld [vmem:[%s1996_s3 + $0x7] ss:$0 sm:$0xff] }
 0x4cc   :  { %990 = vrot.lane.b32.xlu0 %v988_v6, %s1664_s8 }
 0x4cd   :  { %v1631_v22 = vpop.eup %1630 }
 0x4ce   :  { %v511_v23 = vmul.f32 %v1631_v22, %v1799_v51 }
 0x53e   :  { %v991_v24 = vpop.permute.xlu0 %990 }
 0x53f   :  { %v1910_v25 = vsel %vm500_vm6, %v511_v23, %v991_v24 }
 0x540   :  { %1410 = vmatmul.mubr.msk.f32.vlgmr.msra.gmra.mxu0 %vm1013_vm7, %v1910_v25 }
 0x541   :  { %1495 = vmatprep.mubr.msk.f32.mxu0 %vm1663_vm4, %v1662_v48  ;;  %1474 = vmatpush3.msk.msra.mxu0 %vm363_vm2, %v1206_v30 }
 0x542   :  { %1475 = vmatprep.subr.mxu0 %v1662_v48 }
 0x543   :  { %1476 = vmatpush3.msra.mxu0 %v1205_v31 }
 0x544   :  { %1477 = vmatprep.subr.mxu0 %v1662_v48 }
 0x545   :  { %1478 = vmatpush3.msra.mxu0 %v1204_v32 }
 0x546   :  { %1479 = vmatprep.subr.mxu0 %v1662_v48 }
 0x547   :  { %1480 = vmatpush3.msra.mxu0 %v1203_v33 }
 0x548   :  { %1481 = vmatprep.subr.mxu0 %v1662_v48 }
 0x549   :  { %1482 = vmatpush3.msra.mxu0 %v1202_v34 }
 0x54a   :  { %1483 = vmatprep.subr.mxu0 %v1662_v48 }
 0x54b   :  { %1484 = vmatpush3.msra.mxu0 %v1201_v35 }
 0x54c   :  { %1485 = vmatprep.subr.mxu0 %v1662_v48 }
 0x54d   :  { %1486 = vmatpush3.msra.mxu0 %v1200_v36 }
 0x54e   :  { %1487 = vmatprep.subr.mxu0 %v1662_v48 }
 0x54f   :  { %1488 = vmatpush3.msra.mxu0 %v1199_v37 }
 0x550   :  { %1489 = vmatprep.subr.mxu0 %v1662_v48 }
 0x551   :  { %1490 = vmatpush3.msra.mxu0 %v1198_v47 }
 0x552   :  { %1491 = vmatprep.subr.mxu0 %v1662_v48 }
 0x553   :  { %1492 = vmatpush3.msra.mxu0 %v1197_v55 }
 0x554   :  { %1493 = vmatprep.subr.mxu0 %v1662_v48 }
 0x555   :  { %1494 = vmatpush3.msra.mxu0 %v1196_v57 }
 0x600   :  { %v1089_v41 = vpop.f32.mrf.mxu0 }
 0x601   :  { %v1090_v42 = vadd.f32 %v1089_v41, %v1006_v39 }
 0x602   :  { %v1091_v43 = vpop.f32.mrf.mxu0 }
 0x603   :  { %v1092_v44 = vadd.f32 %v1091_v43, %v1010_v40  ;;  %v1094_v46 = vmax.f32 %v1090_v42, 0.0 }
 0x605   :  { %v1095_v45 = vmax.f32 %v1092_v44, 0.0 }
 0x607   :  { %1411 = vmatprep.mubr.msk.f32.mxu1 %vm359_vm3, %v1095_v45 }
 0x608   :  { %1190 = vmatmul.mubr.f32.vlgmr.msra.gmra.mxu1 %v1094_v46 }
 0x6c8   :  { %v1191_v50 = vpop.f32.mrf.mxu1 }
 0x6c9   :  { %v1192_v51 = vadd.f32 %v1191_v50, %v1121_v49 }
 0x6ca   :  { %v1193_v52 = vpop.f32.mrf.mxu1 }
 0x6cb   :  { %v1195_v53 = vmax.f32 %v1192_v51, 0.0 }
 0x6cd   :  { %1496 = vmatmul.mubr.msk.f32.vlgmr.msra.gmra.mxu0 %vm453_vm5, %v1195_v53 }
 0x78d   :  { %v1280_v48 = vpop.f32.mrf.mxu0 }
 0x78e   :  { %v1281_v56 = vadd.f32 %v1280_v48, %v1207_v54 }
 0x78f   :  { %v1497_v58 = vpop.f32.mrf.mxu0 }
 0x790   :  { %v1414_v59 = vmul.f32 -1.442695, %v1281_v56 }
 0x792   :  { %1632 = vpow2.f32 %v1414_v59 }
 0x79f   :  { %v1633_v60 = vpop.eup %1632 }
 0x7a0   :  { %v1287_v61 = vadd.f32 1.0, %v1633_v60 }
 0x7a2   :  { %1634 = vrcp.f32 %v1287_v61 }
 0x7af   :  { %v1635_v62 = vpop.eup %1634 }
 0x7b0   :  { %1291 = vrot.lane.b32.xlu1 %v1635_v62, %s1665_s2 }
 0x822   :  { %v1292_v63 = vpop.permute.xlu1 %1291 }
 0x823   :  { %v1294_v1 = vsel %vm1013_vm7, %v1910_v25, %v1292_v63 }
 0x824   :  { %v1296_v2 = vsel %vm1295_vm8, %v1294_v1, 0.0 }
 0x825   :  { %1297 = vst [vmem:[%s1997_s4] sm:$0xff] %v1296_v2 }
 0x826   :  { %1302 = vsyncpa [#allocation3], 1 }

</bundles_post_ra>
